<compile_context>
chip_gen: v7x
topology: tpu7x:2x2x1
jax: 0.10.0
libtpu: 0.0.40
codegen_flags: <defaults>
</compile_context>

<pallas_src>
import functools
import math

import jax
import jax.numpy as jnp
from jax.experimental import pallas as pl
from jax.experimental.pallas import tpu as pltpu


def _round_up(x, m):
    return ((x + m - 1) // m) * m


# --------------------------------------------------------------------------- #
# Pass A: normalize h1 / h2 (bf16 outputs) + f32 diagonal logits.
# --------------------------------------------------------------------------- #
def _normalize_kernel(scale_ref, h1_ref, h2_ref, h1n_ref, h2n_ref, diag_ref):
    eps_sq = jnp.float32(1e-24)  # (F.normalize eps = 1e-12) ** 2

    # temperature = clamp(exp(logit_scale), max=100)
    temperature = jnp.minimum(jnp.exp(scale_ref[0]), jnp.float32(100.0))

    h1 = h1_ref[...].astype(jnp.float32)
    h1n = h1 * jax.lax.rsqrt(
        jnp.maximum(jnp.sum(h1 * h1, axis=1, keepdims=True), eps_sq))

    h2 = h2_ref[...].astype(jnp.float32)
    h2n = h2 * jax.lax.rsqrt(
        jnp.maximum(jnp.sum(h2 * h2, axis=1, keepdims=True), eps_sq))

    # Diagonal logits as a rowwise f32 dot (kept in full precision).
    diag_ref[...] = temperature * jnp.sum(h1n * h2n, axis=1, keepdims=True)

    # bf16 copies feed the MXU in pass B and halve the repeated HBM reads of h2.
    h1n_ref[...] = h1n.astype(jnp.bfloat16)
    h2n_ref[...] = h2n.astype(jnp.bfloat16)


# --------------------------------------------------------------------------- #
# Pass B: flash-style online logsumexp over column tiles of the logits.
# --------------------------------------------------------------------------- #
def _lse_kernel(scale_ref, diag_ref, h1n_ref, h2n_ref, out_ref,
                m_scratch, l_scratch, *, n_valid, tn, n_pad):
    i = pl.program_id(0)
    j = pl.program_id(1)
    neg_big = jnp.float32(-1e30)

    @pl.when(j == 0)
    def _init_row_tile():
        m_scratch[...] = jnp.full(m_scratch.shape, neg_big, jnp.float32)
        l_scratch[...] = jnp.zeros(l_scratch.shape, jnp.float32)

    temperature = jnp.minimum(jnp.exp(scale_ref[0]), jnp.float32(100.0))

    # scores[r, c] = temperature * <h1n[r], h2n[c]>
    # bf16 operands, f32 accumulation on the MXU; contraction on feature axes
    # (no in-kernel transpose).  Temperature applied post-matmul in f32.
    scores = jax.lax.dot_general(
        h1n_ref[...], h2n_ref[...],
        dimension_numbers=(((1,), (1,)), ((), ())),
        preferred_element_type=jnp.float32) * temperature

    if n_pad > 0:  # static: mask padded columns out of the softmax
        col = jax.lax.broadcasted_iota(jnp.int32, scores.shape, 1) + j * tn
        scores = jnp.where(col < n_valid, scores, neg_big)

    # Online logsumexp accumulation across column tiles.
    m_prev = m_scratch[...]
    m_new = jnp.maximum(m_prev, jnp.max(scores, axis=1, keepdims=True))
    alpha = jnp.exp(m_prev - m_new)
    l_scratch[...] = alpha * l_scratch[...] + jnp.sum(jnp.exp(scores - m_new),
                                                      axis=1, keepdims=True)
    m_scratch[...] = m_new

    @pl.when(j == pl.num_programs(1) - 1)
    def _finalize_row_tile():
        lse = m_scratch[...] + jnp.log(l_scratch[...])
        per_row = lse - diag_ref[...]
        if n_pad > 0:  # static: zero padded rows so the wrapper sum is exact
            tm = per_row.shape[0]
            row = jax.lax.broadcasted_iota(jnp.int32, per_row.shape, 0) + i * tm
            per_row = jnp.where(row < n_valid, per_row, jnp.float32(0.0))
        out_ref[...] = per_row


def clip_head_loss(h1, h2, logit_scale, *, block_rows=128):
    """Pallas implementation of CLIPHead.forward (non-distributed path)."""
    N, C = h1.shape
    assert h2.shape == (N, C)

    # Lane-dense feature dim (multiple of 128); batch padded to the tile.
    Cp = _round_up(max(C, 1), 128)
    TM = min(block_rows, _round_up(N, 8))
    TN = TM
    N_pad = _round_up(N, TM)
    n_pad = N_pad - N

    h1p = jnp.pad(h1.astype(jnp.float32), ((0, N_pad - N), (0, Cp - C)))
    h2p = jnp.pad(h2.astype(jnp.float32), ((0, N_pad - N), (0, Cp - C)))
    scale_arr = jnp.asarray([logit_scale], dtype=jnp.float32)

    # ---- Pass A: normalize + diagonal logits --------------------------------
    h1n, h2n, diag = pl.pallas_call(
        _normalize_kernel,
        out_shape=(
            jax.ShapeDtypeStruct((N_pad, Cp), jnp.bfloat16),
            jax.ShapeDtypeStruct((N_pad, Cp), jnp.bfloat16),
            jax.ShapeDtypeStruct((N_pad, 1), jnp.float32),
        ),
        grid=(N_pad // TM,),
        in_specs=[
            pl.BlockSpec(memory_space=pltpu.MemorySpace.SMEM),   # logit_scale
            pl.BlockSpec((TM, Cp), lambda i: (i, 0)),            # h1 row tile
            pl.BlockSpec((TM, Cp), lambda i: (i, 0)),            # h2 row tile
        ],
        out_specs=(
            pl.BlockSpec((TM, Cp), lambda i: (i, 0)),            # h1n (bf16)
            pl.BlockSpec((TM, Cp), lambda i: (i, 0)),            # h2n (bf16)
            pl.BlockSpec((TM, 1), lambda i: (i, 0)),             # diag (f32)
        ),
        compiler_params=pltpu.CompilerParams(
            dimension_semantics=("parallel",),
            vmem_limit_bytes=32 * 1024 * 1024,
        ),
    )(scale_arr, h1p, h2p)

    # ---- Pass B: tiled online LSE over the NxN logits ------------------------
    grid = (N_pad // TM, N_pad // TN)
    kernel = functools.partial(_lse_kernel, n_valid=N, tn=TN, n_pad=n_pad)

    per_row = pl.pallas_call(
        kernel,
        out_shape=jax.ShapeDtypeStruct((N_pad, 1), jnp.float32),
        grid=grid,
        in_specs=[
            pl.BlockSpec(memory_space=pltpu.MemorySpace.SMEM),   # logit_scale
            pl.BlockSpec((TM, 1), lambda i, j: (i, 0)),          # diag row tile
            pl.BlockSpec((TM, Cp), lambda i, j: (i, 0)),         # h1n row tile
            pl.BlockSpec((TN, Cp), lambda i, j: (j, 0)),         # h2n column tile
        ],
        out_specs=pl.BlockSpec((TM, 1), lambda i, j: (i, 0)),
        scratch_shapes=[
            pltpu.VMEM((TM, 1), jnp.float32),   # running max
            pltpu.VMEM((TM, 1), jnp.float32),   # running sum of exp
        ],
        compiler_params=pltpu.CompilerParams(
            dimension_semantics=("parallel", "arbitrary"),
            vmem_limit_bytes=32 * 1024 * 1024,
        ),
    )(scale_arr, diag, h1n, h2n)

    # Tiny epilogue: mean over the N real rows (padded rows zeroed in-kernel).
    # Done outside the kernel so the row-tile axis can stay 'parallel'.
    return jnp.sum(per_row) / jnp.float32(N)


def _reference_loss(h1, h2, logit_scale):
    # Pure-JAX f32 reference mirroring the PyTorch forward.
    temperature = jnp.minimum(jnp.exp(jnp.float32(logit_scale)), 100.0)
    h1n = h1 / jnp.maximum(jnp.linalg.norm(h1, axis=1, keepdims=True), 1e-12)
    h2n = h2 / jnp.maximum(jnp.linalg.norm(h2, axis=1, keepdims=True), 1e-12)
    logits = (h1n @ h2n.T) * temperature
    n = logits.shape[0]
    lse = jax.scipy.special.logsumexp(logits, axis=1)
    return jnp.mean(lse - logits[jnp.arange(n), jnp.arange(n)])


if __name__ == "__main__":
    key = jax.random.PRNGKey(0)
    k1, k2 = jax.random.split(key)

    # Small shapes consistent with the module: batch of embeddings, feature dim 32.
    N, C = 8, 32
    h1 = jax.random.normal(k1, (N, C), dtype=jnp.float32)
    h2 = jax.random.normal(k2, (N, C), dtype=jnp.float32)
    logit_scale = math.log(1.0 / 0.07)  # standard CLIP logit_scale init

    loss = clip_head_loss(h1, h2, logit_scale)
    jax.block_until_ready(loss)
    ref = _reference_loss(h1, h2, logit_scale)
    # bf16 MXU operands (f32 accumulation) => compare to the f32 reference loosely.
    assert jnp.allclose(loss, ref, rtol=2e-2, atol=5e-2), (loss, ref)

    # Second case exercising the tiled online-LSE path + row/column masking
    # (N not a multiple of the tile, C not a multiple of 128).
    k3, k4 = jax.random.split(k2)
    N2, C2 = 20, 48
    g1 = jax.random.normal(k3, (N2, C2), dtype=jnp.float32)
    g2 = jax.random.normal(k4, (N2, C2), dtype=jnp.float32)
    loss2 = clip_head_loss(g1, g2, logit_scale, block_rows=8)
    jax.block_until_ready(loss2)
    ref2 = _reference_loss(g1, g2, logit_scale)
    assert jnp.allclose(loss2, ref2, rtol=2e-2, atol=5e-2), (loss2, ref2)

    print("KERNEL_OK")
</pallas_src>

<mosaic_0001>
module attributes {stable_mosaic.version = 11 : i64} {
  func.func @_normalize_kernel(%arg0: i32, %arg1: memref<1xf32, #tpu.memory_space<smem>>, %arg2: memref<8x128xf32, #tpu.memory_space<vmem>>, %arg3: memref<8x128xf32, #tpu.memory_space<vmem>>, %arg4: memref<8x128xbf16, #tpu.memory_space<vmem>>, %arg5: memref<8x128xbf16, #tpu.memory_space<vmem>>, %arg6: memref<8x1xf32, #tpu.memory_space<vmem>>) attributes {dimension_semantics = [#tpu.dimension_semantics<parallel>], iteration_bounds = array<i64: 1>, scalar_prefetch = 0 : i64, scratch_operands = 0 : i64, tpu.core_type = #tpu.core_type<tc>, window_params = [{transform_indices = @transform_0, window_bounds = array<i64: 1>}, {transform_indices = @transform_1, window_bounds = array<i64: 8, 128>}, {transform_indices = @transform_2, window_bounds = array<i64: 8, 128>}, {transform_indices = @transform_3, window_bounds = array<i64: 8, 128>}, {transform_indices = @transform_4, window_bounds = array<i64: 8, 128>}, {transform_indices = @transform_5, window_bounds = array<i64: 8, 1>}]} {
    %c0 = arith.constant 0 : index
    %0 = memref.load %arg1[%c0] : memref<1xf32, #tpu.memory_space<smem>>
    %1 = math.exp %0 : f32
    %cst = arith.constant 1.000000e+02 : f32
    %2 = arith.minimumf %1, %cst : f32
    %c0_0 = arith.constant 0 : index
    %c0_1 = arith.constant 0 : index
    %3 = vector.load %arg2[%c0_0, %c0_1] : memref<8x128xf32, #tpu.memory_space<vmem>>, vector<8x128xf32>
    %4 = arith.mulf %3, %3 : vector<8x128xf32>
    %cst_2 = arith.constant dense<0.000000e+00> : vector<8xf32>
    %5 = vector.multi_reduction <add>, %4, %cst_2 [1] : vector<8x128xf32> to vector<8xf32>
    %6 = vector.shape_cast %5 : vector<8xf32> to vector<8x1xf32>
    %cst_3 = arith.constant 1.000000e-24 : f32
    %7 = vector.broadcast %cst_3 : f32 to vector<8x1xf32>
    %8 = arith.maximumf %6, %7 : vector<8x1xf32>
    %9 = math.rsqrt %8 : vector<8x1xf32>
    %10 = vector.broadcast %9 : vector<8x1xf32> to vector<8x128xf32>
    %11 = arith.mulf %3, %10 : vector<8x128xf32>
    %c0_4 = arith.constant 0 : index
    %c0_5 = arith.constant 0 : index
    %12 = vector.load %arg3[%c0_4, %c0_5] : memref<8x128xf32, #tpu.memory_space<vmem>>, vector<8x128xf32>
    %13 = arith.mulf %12, %12 : vector<8x128xf32>
    %cst_6 = arith.constant dense<0.000000e+00> : vector<8xf32>
    %14 = vector.multi_reduction <add>, %13, %cst_6 [1] : vector<8x128xf32> to vector<8xf32>
    %15 = vector.shape_cast %14 : vector<8xf32> to vector<8x1xf32>
    %cst_7 = arith.constant 1.000000e-24 : f32
    %16 = vector.broadcast %cst_7 : f32 to vector<8x1xf32>
    %17 = arith.maximumf %15, %16 : vector<8x1xf32>
    %18 = math.rsqrt %17 : vector<8x1xf32>
    %19 = vector.broadcast %18 : vector<8x1xf32> to vector<8x128xf32>
    %20 = arith.mulf %12, %19 : vector<8x128xf32>
    %21 = arith.mulf %11, %20 : vector<8x128xf32>
    %cst_8 = arith.constant dense<0.000000e+00> : vector<8xf32>
    %22 = vector.multi_reduction <add>, %21, %cst_8 [1] : vector<8x128xf32> to vector<8xf32>
    %23 = vector.shape_cast %22 : vector<8xf32> to vector<8x1xf32>
    %24 = vector.broadcast %2 : f32 to vector<8x1xf32>
    %25 = arith.mulf %24, %23 : vector<8x1xf32>
    %c0_9 = arith.constant 0 : index
    %c0_10 = arith.constant 0 : index
    %26 = vector.load %arg6[%c0_9, %c0_10] : memref<8x1xf32, #tpu.memory_space<vmem>>, vector<8x1xf32>
    tpu.vector_store %arg6[%c0_9, %c0_10], %25 {strides = array<i32>} : memref<8x1xf32, #tpu.memory_space<vmem>>, vector<8x1xf32>,
    %27 = arith.truncf %11 : vector<8x128xf32> to vector<8x128xbf16>
    %c0_11 = arith.constant 0 : index
    %c0_12 = arith.constant 0 : index
    %28 = vector.load %arg4[%c0_11, %c0_12] : memref<8x128xbf16, #tpu.memory_space<vmem>>, vector<8x128xbf16>
    tpu.vector_store %arg4[%c0_11, %c0_12], %27 {strides = array<i32>} : memref<8x128xbf16, #tpu.memory_space<vmem>>, vector<8x128xbf16>,
    %29 = arith.truncf %20 : vector<8x128xf32> to vector<8x128xbf16>
    %c0_13 = arith.constant 0 : index
    %c0_14 = arith.constant 0 : index
    %30 = vector.load %arg5[%c0_13, %c0_14] : memref<8x128xbf16, #tpu.memory_space<vmem>>, vector<8x128xbf16>
    tpu.vector_store %arg5[%c0_13, %c0_14], %29 {strides = array<i32>} : memref<8x128xbf16, #tpu.memory_space<vmem>>, vector<8x128xbf16>,
    return
  }
  func.func @transform_0(%arg0: i32) -> i32 {
    %c0_i32 = arith.constant 0 : i32
    %c0_i32_0 = arith.constant 0 : i32
    return %c0_i32 : i32
  }
  func.func @transform_1(%arg0: i32) -> (i32, i32) {
    %c0_i32 = arith.constant 0 : i32
    %c0_i32_0 = arith.constant 0 : i32
    return %arg0, %c0_i32 : i32, i32
  }
  func.func @transform_2(%arg0: i32) -> (i32, i32) {
    %c0_i32 = arith.constant 0 : i32
    %c0_i32_0 = arith.constant 0 : i32
    return %arg0, %c0_i32 : i32, i32
  }
  func.func @transform_3(%arg0: i32) -> (i32, i32) {
    %c0_i32 = arith.constant 0 : i32
    %c0_i32_0 = arith.constant 0 : i32
    return %arg0, %c0_i32 : i32, i32
  }
  func.func @transform_4(%arg0: i32) -> (i32, i32) {
    %c0_i32 = arith.constant 0 : i32
    %c0_i32_0 = arith.constant 0 : i32
    return %arg0, %c0_i32 : i32, i32
  }
  func.func @transform_5(%arg0: i32) -> (i32, i32) {
    %c0_i32 = arith.constant 0 : i32
    %c0_i32_0 = arith.constant 0 : i32
    return %arg0, %c0_i32 : i32, i32
  }
}

</mosaic_0001>

<bundles_post_ra>
// kernel: tpu_custom_call.1
= control target key start
LH: loop header
LB: loop body
LE: loop exit
PB: predicated region body
PF: predicated region fallthrough
CT: control target
= control target key end

     0   :  { %12 = vsyncpa [#allocation4], 0  ;;  %s307_s0 = inlined_call_operand.<no memory space> [shape: f32[1], index: 0, kind: input, shape index: {}]   ;;  %s308_s1 = inlined_call_operand.hbm [shape: f32[8,128], index: 1, kind: input, shape index: {}]   ;;  %s309_s2 = inlined_call_operand.hbm [shape: f32[8,128], index: 2, kind: input, shape index: {}]   ;;  %s310_s3 = inlined_call_operand.hbm [shape: bf16[8,128], index: 3, kind: output, shape index: {0}]   ;;  %s311_s4 = inlined_call_operand.hbm [shape: bf16[8,128], index: 4, kind: output, shape index: {1}]   ;;  %s312_s5 = inlined_call_operand.vmem [shape: f32[8,1], index: 5, kind: output, shape index: {2}]  }
   0x1   :  { %13 = vsyncpa [#allocation7], 0 }
   0x2   :  { %14 = vsyncpa [#allocation5], 0 }
   0x3   :  { %15 = vsyncpa [#allocation10], 0  ;;  %s218_s18 = smov [#allocation3]   ;;  %s219_s20 = smov [#allocation6]  }
   0x4   :  { %s24_s19 = sshll.u32 %s218_s18, 4  ;;  %s34_s21 = sshll.u32 %s219_s20, 4  ;;  %s25_s19 = int_to_ptr.vmem [resolvable:$true] %s24_s19  ;;  %s35_s21 = int_to_ptr.vmem [resolvable:$true] %s34_s21 }
   0x5   :  { %s122_s24 = scalar_lea.hbm %s308_s1, 128 }
   0x6   :  { %p123_p0 = scmp.ne.s32.totalorder %s308_s1, %s122_s24  ;;  %p126_p1 = scmp.lt.u32.totalorder %s122_s24, %s308_s1 }
   0x8   :  { %p128_p2 = pnand %p126_p1, %p123_p0 }
   0xa   :  { %131 = shalt.err (!%p128_p2)
}
   0xb   :  { %s132_s29 = scalar_lea.vmem %s25_s19, 128  ;;  %p137_p4 = scmp.lt.s32.totalorder %s25_s19, %s25_s19 }
   0xc   :  { %p133_p3 = scmp.ne.s32.totalorder %s25_s19, %s132_s29  ;;  %p138_p5 = scmp.lt.s32.totalorder %s132_s29, %s132_s29 }
   0xe   :  { %p139_p6 = por %p138_p5, %p137_p4 }
  0x10   :  { %p140_p7 = pnand %p139_p6, %p133_p3 }
  0x12   :  { %143 = shalt.err (!%p140_p7)
}
  0x13   :  { %27 = dma.hbm_to_vmem [thread:$0]  %s308_s1, 128, %s25_s19, [#allocation4]  }
  0x14   :  { %s144_s9 = scalar_lea.hbm %s309_s2, 128 }
  0x15   :  { %p145_p8 = scmp.ne.s32.totalorder %s309_s2, %s144_s9  ;;  %p148_p9 = scmp.lt.u32.totalorder %s144_s9, %s309_s2 }
  0x17   :  { %p150_p10 = pnand %p148_p9, %p145_p8 }
  0x19   :  { %153 = shalt.err (!%p150_p10)
}
  0x1a   :  { %s154_s14 = scalar_lea.vmem %s35_s21, 128  ;;  %p159_p12 = scmp.lt.s32.totalorder %s35_s21, %s35_s21 }
  0x1b   :  { %p155_p11 = scmp.ne.s32.totalorder %s35_s21, %s154_s14  ;;  %p160_p13 = scmp.lt.s32.totalorder %s154_s14, %s154_s14 }
  0x1d   :  { %p161_p0 = por %p160_p13, %p159_p12 }
  0x1f   :  { %p162_p1 = pnand %p161_p0, %p155_p11 }
  0x21   :  { %165 = shalt.err (!%p162_p1)
}
  0x22   :  { %37 = dma.hbm_to_vmem [thread:$0]  %s309_s2, 128, %s35_s21, [#allocation7]  }
  0x23   :  { %210 = dma.done.wait [#allocation4], 128  }
  0x24   :  { %211 = vsyncadd [#allocation4], 4294967168 }
  0x25   :  { %212 = dma.done.wait [#allocation7], 128  }
  0x26   :  { %213 = vsyncadd [#allocation7], 4294967168  ;;  %v50_v0 = vld [vmem:[#allocation3] sm:$0xff]  ;;  %v57_v1 = vld [vmem:[#allocation6] sm:$0xff]  ;;  %v45_v4 = vstv %s307_s0  ;;  %s220_s0 = smov [#allocation8]   ;;  %s221_s18 = smov [#allocation9]  }
  0x27   :  { %v51_v2 = vmul.f32 %v50_v0, %v50_v0  ;;  %v58_v3 = vmul.f32 %v57_v1, %v57_v1  ;;  %v46_v5 = vmul.f32 1.442695, %v45_v4  ;;  %s81_s2 = sshll.u32 %s220_s0, 4  ;;  %s91_s19 = sshll.u32 %s221_s18, 4  ;;  %s82_s2 = int_to_ptr.vmem [resolvable:$true] %s81_s2  ;;  %s92_s19 = int_to_ptr.vmem [resolvable:$true] %s91_s19 }
  0x28   :  { %s166_s20 = scalar_lea.vmem %s82_s2, 64  ;;  %p171_p3 = scmp.lt.s32.totalorder %s82_s2, %s82_s2 }
  0x29   :  { %52 = vadd.xlane.f32.xlu0 %v51_v2  ;;  %116 = vpow2.f32 %v46_v5  ;;  %p167_p2 = scmp.ne.s32.totalorder %s82_s2, %s166_s20  ;;  %p172_p4 = scmp.lt.s32.totalorder %s166_s20, %s166_s20 }
  0x2b   :  { %p173_p5 = por %p172_p4, %p171_p3 }
  0x2d   :  { %59 = vadd.xlane.f32.xlu0 %v58_v3  ;;  %p174_p6 = pnand %p173_p5, %p167_p2 }
  0x33   :  { %v117_v6 = vpop.eup %116 }
  0x34   :  { %109 = vpush %v117_v6 }
  0xb6   :  { %v53_v7 = vpop.xlane.xlu0 %52 }
  0xb7   :  { %v54_v8 = vmax.f32 %v53_v7, 1e-24 }
  0xb9   :  { %118 = vrsqrt.f32 %v54_v8 }
  0xba   :  { %v60_v9 = vpop.xlane.xlu0 %59 }
  0xbb   :  { %v61_v10 = vmax.f32 %v60_v9, 1e-24 }
  0xbd   :  { %120 = vrsqrt.f32 %v61_v10 }
  0xc3   :  { %v119_v11 = vpop.eup %118 }
  0xc4   :  { %v56_v12 = vmul.f32 %v119_v11, %v50_v0 }
  0xc6   :  { %v71_v13 = vpack.c.bf16 %v56_v12, %v56_v12 }
  0xc7   :  { %v121_v14 = vpop.eup %120 }
  0xc8   :  { %v63_v15 = vmul.f32 %v121_v14, %v57_v1  ;;  %72 = vst [vmem:[#allocation8] sm:$0xf] %v71_v13 }
  0xca   :  { %v64_v16 = vmul.f32 %v63_v15, %v56_v12  ;;  %v73_v17 = vpack.c.bf16 %v63_v15, %v63_v15 }
  0xcc   :  { %65 = vadd.xlane.f32.xlu1 %v64_v16  ;;  %74 = vst [vmem:[#allocation9] sm:$0xf] %v73_v17 }
  0xcd   :  { %177 = shalt.err (!%p174_p6)
}
  0xce   :  { %s178_s23 = scalar_lea.hbm %s310_s3, 64 }
  0xcf   :  { %p179_p7 = scmp.ne.s32.totalorder %s310_s3, %s178_s23  ;;  %p182_p8 = scmp.lt.u32.totalorder %s178_s23, %s310_s3 }
  0xd1   :  { %p184_p9 = pnand %p182_p8, %p179_p7 }
  0xd3   :  { %187 = shalt.err (!%p184_p9)
}
  0xd4   :  { %84 = dma.vmem_to_hbm [thread:$0]  %s82_s2, 64, %s310_s3, [#allocation5]  }
  0xd5   :  { %s188_s30 = scalar_lea.vmem %s92_s19, 64  ;;  %p193_p11 = scmp.lt.s32.totalorder %s92_s19, %s92_s19 }
  0xd6   :  { %p189_p10 = scmp.ne.s32.totalorder %s92_s19, %s188_s30  ;;  %p194_p12 = scmp.lt.s32.totalorder %s188_s30, %s188_s30 }
  0xd8   :  { %p195_p13 = por %p194_p12, %p193_p11 }
  0xda   :  { %p196_p0 = pnand %p195_p13, %p189_p10 }
  0xdc   :  { %199 = shalt.err (!%p196_p0)
}
  0xdd   :  { %s200_s8 = scalar_lea.hbm %s311_s4, 64 }
  0xde   :  { %p201_p1 = scmp.ne.s32.totalorder %s311_s4, %s200_s8  ;;  %p204_p2 = scmp.lt.u32.totalorder %s200_s8, %s311_s4 }
  0xe0   :  { %p206_p3 = pnand %p204_p2, %p201_p1 }
  0xe2   :  { %209 = shalt.err (!%p206_p3)
}
  0xe3   :  { %94 = dma.vmem_to_hbm [thread:$0]  %s92_s19, 64, %s311_s4, [#allocation10]   ;;  %vm69_vm0 = vcmask 7168  }
  0xe4   :  { %s110_s14 = spop %109  ;;  %s222_s1 = smov 100.0  }
  0xe5   :  { %s49_s15 = smin.f32 %s222_s1, %s110_s14 }
  0xe6   :  { %v67_v18 = vstv %s49_s15 }
 0x159   :  { %v66_v19 = vpop.xlane.xlu1 %65 }
 0x15a   :  { %v68_v20 = vmul.f32 %v67_v18, %v66_v19 }
 0x15c   :  { %70 = vst.msk [vmem:[%s312_s5] sm:$0xff] %vm69_vm0, %v68_v20 }
 0x15d   :  { %214 = dma.done.wait [#allocation5], 64  }
 0x15e   :  { %215 = vsyncadd [#allocation5], 4294967232 }
 0x15f   :  { %216 = dma.done.wait [#allocation10], 64  }
 0x160   :  { %217 = vsyncadd [#allocation10], 4294967232 }
 0x161   :  { %105 = vsyncpa [#allocation4], 1 }
 0x162   :  { %106 = vsyncpa [#allocation7], 1 }
 0x163   :  { %107 = vsyncpa [#allocation5], 1 }
 0x164   :  { %108 = vsyncpa [#allocation10], 1 }

</bundles_post_ra>
